<compile_context>
chip_gen: v6e
topology: v6e:2x2x1
jax: 0.10.0
libtpu: 0.0.40
codegen_flags: <defaults>
</compile_context>

<pallas_src>
import math

import jax
import jax.numpy as jnp
from jax.experimental import pallas as pl
from jax.experimental.pallas import tpu as pltpu

# ---------------- small-shape configuration ----------------
B = 2                  # batch
IN_CH = 3              # image channels fed to the backbone
T = 16                 # time frames
MEL = 16               # mel bins (192 in the full model)
NUM_FEATURES = 32      # backbone.num_features (stand-in)
NUM_CLASSES = 10
HO = MEL // 2          # backbone output "mel" size (stride-2 stem)
WO = T // 2            # backbone output "time" size
HW = HO * WO
BWO = B * WO
KC = IN_CH * 9         # conv3x3 patch width (27)
KC_PAD = 32            # padded contraction dim for the stem matmul
LANES = 128
OUT_ROWS = 16          # WO frame rows + clip + maxframe + clip_fc + zero pad
BN_EPS = 1e-5

assert WO & (WO - 1) == 0, "time-pool masking below uses a power-of-two WO"

# packed-weight row offsets (contraction dim along sublanes, all 32-row blocks)
W_CONV0 = 0
W_FC10 = KC_PAD
W_HEAD0 = KC_PAD + NUM_FEATURES
W_FCSEQ0 = KC_PAD + 2 * NUM_FEATURES
W_ROWS = KC_PAD + 3 * NUM_FEATURES          # = 128


# ---------------- fused forward kernel (single invocation, whole batch) ----------------

def _fused_kernel(patches_ref, wpack_ref, vpack_ref, out_ref):
    NF, C = NUM_FEATURES, NUM_CLASSES

    vp = vpack_ref[...]                                   # (8, 128) f32
    conv_b = vp[0:1, 0:NF]
    bn1_s = vp[1:2, 0:NF]
    bn1_h = vp[2:3, 0:NF]
    fc1_b = vp[3:4, 0:NF]
    head_b = vp[4:5, :]                                   # cla_b @ 0:C, att_b @ C:2C
    fc_b = vp[5:6, :]                                     # fc_seq bias @ 0:C

    # --- backbone stand-in: conv3x3(s2,p1) as one batched MXU matmul + ReLU ---
    feat = jnp.dot(patches_ref[...], wpack_ref[W_CONV0:W_CONV0 + KC_PAD, 0:NF],
                   preferred_element_type=jnp.float32)    # (B*HW, NF)
    feat = jnp.maximum(feat + conv_b, 0.0)                # rows ordered (ho, b, wo)

    # --- x = mean over mel: rows are ho-major, so each slab of BWO rows is one ho ---
    xm = feat[0:BWO, :]
    for h in range(1, HO):                                # static, unrolled at trace time
        xm = xm + feat[h * BWO:(h + 1) * BWO, :]
    xm = xm * (1.0 / HO)                                  # (B*WO, NF), rows = (b, t)

    # --- features = AdaptiveAvgPool2d(1) == mean over time of the mel-mean ---
    rows = [jnp.mean(xm[b * WO:(b + 1) * WO, :], axis=0, keepdims=True) for b in range(B)]
    rows.append(jnp.zeros((8 - B, NF), jnp.float32))      # pad LHS to 8 sublanes
    feats = jnp.concatenate(rows, axis=0)                 # (8, NF), rows 0:B real
    # fc_seq (eval): Dropout -> BatchNorm1d affine -> Linear
    fn = feats * bn1_s + bn1_h
    clip_fc = jnp.dot(fn.astype(jnp.bfloat16), wpack_ref[W_FCSEQ0:W_FCSEQ0 + NF, :],
                      preferred_element_type=jnp.float32) + fc_b     # (8, 128), 0:C real

    # --- max_pool1d(3,1,1) + avg_pool1d(3,1,1) along time (per-batch boundaries) ---
    t_idx = jax.lax.broadcasted_iota(jnp.int32, (BWO, NF), 0) & (WO - 1)
    x_prev = pltpu.roll(xm, shift=1, axis=0)              # x[t-1] (wrapped across batches)
    x_next = pltpu.roll(xm, shift=BWO - 1, axis=0)        # x[t+1] (wrapped across batches)
    prev_m = jnp.where(t_idx == 0, -jnp.inf, x_prev)      # max pool pads with -inf
    next_m = jnp.where(t_idx == WO - 1, -jnp.inf, x_next)
    prev_a = jnp.where(t_idx == 0, 0.0, x_prev)           # avg pool: count_include_pad=True
    next_a = jnp.where(t_idx == WO - 1, 0.0, x_next)
    x1 = jnp.maximum(jnp.maximum(prev_m, xm), next_m)
    x2 = (prev_a + xm + next_a) * (1.0 / 3.0)
    xp = x1 + x2                                          # (B*WO, NF)

    # --- fc1 + ReLU (applied per time step) ---
    h1 = jnp.dot(xp.astype(jnp.bfloat16), wpack_ref[W_FC10:W_FC10 + NF, 0:NF],
                 preferred_element_type=jnp.float32) + fc1_b
    h1 = jnp.maximum(h1, 0.0)                             # (B*WO, NF)

    # --- AttBlockV2: both 1x1-conv heads fused in one matmul (cla @ 0:C, att @ C:2C) ---
    head = jnp.dot(h1.astype(jnp.bfloat16), wpack_ref[W_HEAD0:W_HEAD0 + NF, :],
                   preferred_element_type=jnp.float32) + head_b      # (B*WO, 128)
    cla = 0.5 * (jnp.tanh(0.5 * head) + 1.0)              # sigmoid via EUP tanh; 0:C real
    att_aligned = pltpu.roll(head, shift=LANES - C, axis=1)          # att logits -> lanes 0:C
    na = jnp.tanh(att_aligned)

    # --- per-batch softmax over time + heads; write one lane-dense (OUT_ROWS,128) slab ---
    for b in range(B):                                    # B=2, static loop
        na_b = na[b * WO:(b + 1) * WO, :]                 # (WO, 128)
        cla_b = cla[b * WO:(b + 1) * WO, :]
        m = jnp.max(na_b, axis=0, keepdims=True)
        e = jnp.exp(na_b - m)
        norm_att = e * pl.reciprocal(jnp.sum(e, axis=0, keepdims=True), approx=True)
        clip_b = jnp.sum(norm_att * cla_b, axis=0, keepdims=True)    # (1, 128)
        maxf_b = jnp.max(cla_b, axis=0, keepdims=True)               # (1, 128)

        out_ref[b, 0:WO, :] = cla_b                                  # framewise (time-major)
        out_ref[b, WO:WO + 1, :] = clip_b                            # clipwise
        out_ref[b, WO + 1:WO + 2, :] = maxf_b                        # maxframewise
        out_ref[b, WO + 2:WO + 3, :] = clip_fc[b:b + 1, :]           # clipwise_fc
        out_ref[b, WO + 3:OUT_ROWS, :] = jnp.zeros((OUT_ROWS - WO - 3, LANES), jnp.float32)


# ---------------- parameters ----------------

def init_params(key):
    ks = jax.random.split(key, 5)

    def nrm(k, shape, scale=0.05):
        return scale * jax.random.normal(k, shape, dtype=jnp.float32)

    p = {}
    # bn0 = BatchNorm2d(mel_bins); init_bn -> weight=1, bias=0; fresh running stats
    p['bn0_gamma'] = jnp.ones((MEL,), jnp.float32)
    p['bn0_beta'] = jnp.zeros((MEL,), jnp.float32)
    p['bn0_mean'] = jnp.zeros((MEL,), jnp.float32)
    p['bn0_var'] = jnp.ones((MEL,), jnp.float32)
    # TODO(synk): stand-in for timm backbone — conv3x3 s2 p1 stem weights.
    p['conv_w'] = nrm(ks[0], (KC, NUM_FEATURES))
    p['conv_b'] = jnp.zeros((NUM_FEATURES,), jnp.float32)
    # fc_seq: Dropout -> BatchNorm1d(num_features) -> Linear(num_features, num_classes)
    p['bn1_gamma'] = jnp.ones((NUM_FEATURES,), jnp.float32)
    p['bn1_beta'] = jnp.zeros((NUM_FEATURES,), jnp.float32)
    p['bn1_mean'] = jnp.zeros((NUM_FEATURES,), jnp.float32)
    p['bn1_var'] = jnp.ones((NUM_FEATURES,), jnp.float32)
    p['fc_w'] = nrm(ks[1], (NUM_FEATURES, NUM_CLASSES))
    p['fc_b'] = jnp.zeros((NUM_CLASSES,), jnp.float32)
    # fc1 (init_layer: xavier, zero bias)
    p['fc1_w'] = nrm(ks[2], (NUM_FEATURES, NUM_FEATURES),
                     scale=math.sqrt(2.0 / (NUM_FEATURES + NUM_FEATURES)))
    p['fc1_b'] = jnp.zeros((NUM_FEATURES,), jnp.float32)
    # AttBlockV2 att/cla 1x1 convs (xavier, zero bias), stored as (in, out)
    xav = math.sqrt(2.0 / (NUM_FEATURES + NUM_CLASSES))
    p['att_w'] = nrm(ks[3], (NUM_FEATURES, NUM_CLASSES), scale=xav)
    p['att_b'] = jnp.zeros((NUM_CLASSES,), jnp.float32)
    p['cla_w'] = nrm(ks[4], (NUM_FEATURES, NUM_CLASSES), scale=xav)
    p['cla_b'] = jnp.zeros((NUM_CLASSES,), jnp.float32)
    return p


def _pack_params(p):
    """Pack all small weights/biases into one bf16 weight slab + one f32 vector slab."""
    NF, C = NUM_FEATURES, NUM_CLASSES
    wpack = jnp.zeros((W_ROWS, LANES), jnp.float32)
    wpack = wpack.at[W_CONV0:W_CONV0 + KC, 0:NF].set(p['conv_w'])
    wpack = wpack.at[W_FC10:W_FC10 + NF, 0:NF].set(p['fc1_w'])
    wpack = wpack.at[W_HEAD0:W_HEAD0 + NF, 0:C].set(p['cla_w'])
    wpack = wpack.at[W_HEAD0:W_HEAD0 + NF, C:2 * C].set(p['att_w'])
    wpack = wpack.at[W_FCSEQ0:W_FCSEQ0 + NF, 0:C].set(p['fc_w'])
    wpack = wpack.astype(jnp.bfloat16)                    # (128, 128) bf16

    bn1_scale = p['bn1_gamma'] * jax.lax.rsqrt(p['bn1_var'] + BN_EPS)
    bn1_shift = p['bn1_beta'] - p['bn1_mean'] * bn1_scale
    vpack = jnp.zeros((8, LANES), jnp.float32)
    vpack = vpack.at[0, 0:NF].set(p['conv_b'])
    vpack = vpack.at[1, 0:NF].set(bn1_scale)
    vpack = vpack.at[2, 0:NF].set(bn1_shift)
    vpack = vpack.at[3, 0:NF].set(p['fc1_b'])
    vpack = vpack.at[4, 0:C].set(p['cla_b'])
    vpack = vpack.at[4, C:2 * C].set(p['att_b'])
    vpack = vpack.at[5, 0:C].set(p['fc_b'])
    return wpack, vpack


# ---------------- forward (thin XLA prologue + one fused pallas_call) ----------------

def birdclef_forward(x, p):
    # x: (B, C_in, T, MEL)
    B_ = x.shape[0]
    # transpose(1,3) -> bn0 -> transpose(1,3)  ==  per-mel-bin affine on the last axis
    scale0 = p['bn0_gamma'] * jax.lax.rsqrt(p['bn0_var'] + BN_EPS)
    shift0 = p['bn0_beta'] - p['bn0_mean'] * scale0
    xn = x * scale0 + shift0
    # transpose(2,3): (B, C_in, MEL, T) — backbone input layout
    xn = jnp.transpose(xn, (0, 1, 3, 2))
    # conv3x3 s2 p1 patch extraction (single XLA op)
    patches = jax.lax.conv_general_dilated_patches(
        xn, filter_shape=(3, 3), window_strides=(2, 2),
        padding=((1, 1), (1, 1)))                          # (B, C_in*9, HO, WO)
    # rows ordered (ho, b, wo) so the in-kernel mel reduction is over contiguous slabs
    patches = jnp.transpose(patches, (2, 0, 3, 1)).reshape(HO * B_ * WO, KC)
    patches = jnp.pad(patches, ((0, 0), (0, KC_PAD - KC))).astype(jnp.bfloat16)

    wpack, vpack = _pack_params(p)

    vmem = pl.BlockSpec(memory_space=pltpu.MemorySpace.VMEM)
    out = pl.pallas_call(
        _fused_kernel,
        out_shape=jax.ShapeDtypeStruct((B_, OUT_ROWS, LANES), jnp.float32),
        in_specs=[vmem, vmem, vmem],
        out_specs=vmem,
    )(patches, wpack, vpack)

    C = NUM_CLASSES
    return {
        'clipwise_output': out[:, WO, 0:C],
        'framewise_output': jnp.transpose(out[:, 0:WO, 0:C], (0, 2, 1)),  # (B, C, T')
        'maxframewise_output': out[:, WO + 1, 0:C],
        'clipwise_fc': out[:, WO + 2, 0:C],
    }


# ---------------- pure-JAX reference (sanity check only) ----------------

def reference_forward(x, p):
    B_ = x.shape[0]
    scale0 = p['bn0_gamma'] / jnp.sqrt(p['bn0_var'] + BN_EPS)
    shift0 = p['bn0_beta'] - p['bn0_mean'] * scale0
    xn = jnp.transpose(x * scale0 + shift0, (0, 1, 3, 2))
    pat = jax.lax.conv_general_dilated_patches(
        xn, (3, 3), (2, 2), ((1, 1), (1, 1)))
    pat = jnp.transpose(pat, (0, 2, 3, 1)).reshape(B_, HW, KC)
    feat = jnp.maximum(pat @ p['conv_w'] + p['conv_b'], 0.0)        # (B, HW, NF)
    feat4 = feat.reshape(B_, HO, WO, NUM_FEATURES)
    features = feat.mean(axis=1)                                    # (B, NF)
    bscale = p['bn1_gamma'] / jnp.sqrt(p['bn1_var'] + BN_EPS)
    bshift = p['bn1_beta'] - p['bn1_mean'] * bscale
    clip_fc = (features * bscale + bshift) @ p['fc_w'] + p['fc_b']
    xm = feat4.mean(axis=1)                                         # (B, WO, NF)
    pad_m = jnp.pad(xm, ((0, 0), (1, 1), (0, 0)), constant_values=-jnp.inf)
    x1 = jnp.maximum(jnp.maximum(pad_m[:, :-2], pad_m[:, 1:-1]), pad_m[:, 2:])
    pad_a = jnp.pad(xm, ((0, 0), (1, 1), (0, 0)))
    x2 = (pad_a[:, :-2] + pad_a[:, 1:-1] + pad_a[:, 2:]) / 3.0
    xp = x1 + x2
    h = jnp.maximum(xp @ p['fc1_w'] + p['fc1_b'], 0.0)
    na = jax.nn.softmax(jnp.tanh(h @ p['att_w'] + p['att_b']), axis=1)
    cla = jax.nn.sigmoid(h @ p['cla_w'] + p['cla_b'])
    return {
        'clipwise_output': jnp.sum(na * cla, axis=1),
        'framewise_output': jnp.transpose(cla, (0, 2, 1)),
        'maxframewise_output': jnp.max(cla, axis=1),
        'clipwise_fc': clip_fc,
    }


if __name__ == "__main__":
    key = jax.random.PRNGKey(0)
    pkey, xkey = jax.random.split(key)
    params = init_params(pkey)
    x = jax.random.normal(xkey, (B, IN_CH, T, MEL), dtype=jnp.float32)

    fwd = jax.jit(birdclef_forward)
    out = jax.block_until_ready(fwd(x, params))

    assert out['clipwise_output'].shape == (B, NUM_CLASSES)
    assert out['framewise_output'].shape == (B, NUM_CLASSES, WO)
    assert out['maxframewise_output'].shape == (B, NUM_CLASSES)
    assert out['clipwise_fc'].shape == (B, NUM_CLASSES)
    for v in out.values():
        assert bool(jnp.all(jnp.isfinite(v)))

    ref = reference_forward(x, params)
    for k in out:
        assert bool(jnp.allclose(out[k], ref[k], atol=5e-2, rtol=5e-2)), k

    print("KERNEL_OK")
</pallas_src>

<mosaic_0001>
module attributes {stable_mosaic.version = 11 : i64} {
  func.func @_fused_kernel(%arg0: memref<128x32xbf16, #tpu.memory_space<vmem>>, %arg1: memref<128x128xbf16, #tpu.memory_space<vmem>>, %arg2: memref<8x128xf32, #tpu.memory_space<vmem>>, %arg3: memref<2x16x128xf32, #tpu.memory_space<vmem>>) attributes {dimension_semantics = [], scalar_prefetch = 0 : i64, scratch_operands = 0 : i64, tpu.core_type = #tpu.core_type<tc>} {
    %c0 = arith.constant 0 : index
    %c0_0 = arith.constant 0 : index
    %0 = vector.load %arg2[%c0, %c0_0] : memref<8x128xf32, #tpu.memory_space<vmem>>, vector<8x128xf32>
    %1 = vector.extract_strided_slice %0 {offsets = [0, 0], sizes = [1, 32], strides = [1, 1]} : vector<8x128xf32> to vector<1x32xf32>
    %2 = vector.extract_strided_slice %0 {offsets = [1, 0], sizes = [1, 32], strides = [1, 1]} : vector<8x128xf32> to vector<1x32xf32>
    %3 = vector.extract_strided_slice %0 {offsets = [2, 0], sizes = [1, 32], strides = [1, 1]} : vector<8x128xf32> to vector<1x32xf32>
    %4 = vector.extract_strided_slice %0 {offsets = [3, 0], sizes = [1, 32], strides = [1, 1]} : vector<8x128xf32> to vector<1x32xf32>
    %5 = vector.extract_strided_slice %0 {offsets = [4, 0], sizes = [1, 128], strides = [1, 1]} : vector<8x128xf32> to vector<1x128xf32>
    %6 = vector.extract_strided_slice %0 {offsets = [5, 0], sizes = [1, 128], strides = [1, 1]} : vector<8x128xf32> to vector<1x128xf32>
    %c0_1 = arith.constant 0 : index
    %c0_2 = arith.constant 0 : index
    %7 = vector.load %arg0[%c0_1, %c0_2] : memref<128x32xbf16, #tpu.memory_space<vmem>>, vector<128x32xbf16>
    %c0_3 = arith.constant 0 : index
    %c0_4 = arith.constant 0 : index
    %8 = vector.load %arg1[%c0_3, %c0_4] : memref<128x128xbf16, #tpu.memory_space<vmem>>, vector<32x32xbf16>
    %cst = arith.constant dense<0.000000e+00> : vector<128x32xf32>
    %9 = tpu.matmul %7, %8, %cst {dimension_numbers = #tpu.dot_dimension_numbers<[1], [0], [0], [1], [0, 0, 1, 1], [], []>} : vector<128x32xbf16>, vector<32x32xbf16>, vector<128x32xf32> -> vector<128x32xf32>
    %10 = vector.broadcast %1 : vector<1x32xf32> to vector<128x32xf32>
    %11 = arith.addf %9, %10 : vector<128x32xf32>
    %cst_5 = arith.constant 0.000000e+00 : f32
    %12 = vector.broadcast %cst_5 : f32 to vector<128x32xf32>
    %13 = arith.maximumf %11, %12 : vector<128x32xf32>
    %14 = vector.extract_strided_slice %13 {offsets = [0, 0], sizes = [16, 32], strides = [1, 1]} : vector<128x32xf32> to vector<16x32xf32>
    %15 = vector.extract_strided_slice %13 {offsets = [16, 0], sizes = [16, 32], strides = [1, 1]} : vector<128x32xf32> to vector<16x32xf32>
    %16 = arith.addf %14, %15 : vector<16x32xf32>
    %17 = vector.extract_strided_slice %13 {offsets = [32, 0], sizes = [16, 32], strides = [1, 1]} : vector<128x32xf32> to vector<16x32xf32>
    %18 = arith.addf %16, %17 : vector<16x32xf32>
    %19 = vector.extract_strided_slice %13 {offsets = [48, 0], sizes = [16, 32], strides = [1, 1]} : vector<128x32xf32> to vector<16x32xf32>
    %20 = arith.addf %18, %19 : vector<16x32xf32>
    %21 = vector.extract_strided_slice %13 {offsets = [64, 0], sizes = [16, 32], strides = [1, 1]} : vector<128x32xf32> to vector<16x32xf32>
    %22 = arith.addf %20, %21 : vector<16x32xf32>
    %23 = vector.extract_strided_slice %13 {offsets = [80, 0], sizes = [16, 32], strides = [1, 1]} : vector<128x32xf32> to vector<16x32xf32>
    %24 = arith.addf %22, %23 : vector<16x32xf32>
    %25 = vector.extract_strided_slice %13 {offsets = [96, 0], sizes = [16, 32], strides = [1, 1]} : vector<128x32xf32> to vector<16x32xf32>
    %26 = arith.addf %24, %25 : vector<16x32xf32>
    %27 = vector.extract_strided_slice %13 {offsets = [112, 0], sizes = [16, 32], strides = [1, 1]} : vector<128x32xf32> to vector<16x32xf32>
    %28 = arith.addf %26, %27 : vector<16x32xf32>
    %cst_6 = arith.constant 1.250000e-01 : f32
    %29 = vector.broadcast %cst_6 : f32 to vector<16x32xf32>
    %30 = arith.mulf %28, %29 : vector<16x32xf32>
    %31 = vector.extract_strided_slice %30 {offsets = [0, 0], sizes = [8, 32], strides = [1, 1]} : vector<16x32xf32> to vector<8x32xf32>
    %cst_7 = arith.constant dense<0.000000e+00> : vector<32xf32>
    %32 = vector.multi_reduction <add>, %31, %cst_7 [0] : vector<8x32xf32> to vector<32xf32>
    %33 = vector.shape_cast %32 : vector<32xf32> to vector<1x32xf32>
    %cst_8 = arith.constant 8.000000e+00 : f32
    %34 = vector.broadcast %cst_8 : f32 to vector<1x32xf32>
    %35 = arith.divf %33, %34 : vector<1x32xf32>
    %36 = vector.extract_strided_slice %30 {offsets = [8, 0], sizes = [8, 32], strides = [1, 1]} : vector<16x32xf32> to vector<8x32xf32>
    %cst_9 = arith.constant dense<0.000000e+00> : vector<32xf32>
    %37 = vector.multi_reduction <add>, %36, %cst_9 [0] : vector<8x32xf32> to vector<32xf32>
    %38 = vector.shape_cast %37 : vector<32xf32> to vector<1x32xf32>
    %cst_10 = arith.constant 8.000000e+00 : f32
    %39 = vector.broadcast %cst_10 : f32 to vector<1x32xf32>
    %40 = arith.divf %38, %39 : vector<1x32xf32>
    %cst_11 = arith.constant 0.000000e+00 : f32
    %41 = vector.broadcast %cst_11 : f32 to vector<6x32xf32>
    %42 = tpu.concatenate %35, %40, %41 in 0 : vector<1x32xf32>, vector<1x32xf32>, vector<6x32xf32> -> vector<8x32xf32>
    %43 = vector.broadcast %2 : vector<1x32xf32> to vector<8x32xf32>
    %44 = arith.mulf %42, %43 : vector<8x32xf32>
    %45 = vector.broadcast %3 : vector<1x32xf32> to vector<8x32xf32>
    %46 = arith.addf %44, %45 : vector<8x32xf32>
    %47 = arith.truncf %46 : vector<8x32xf32> to vector<8x32xbf16>
    %c96 = arith.constant 96 : index
    %c0_12 = arith.constant 0 : index
    %48 = vector.load %arg1[%c96, %c0_12] : memref<128x128xbf16, #tpu.memory_space<vmem>>, vector<32x128xbf16>
    %cst_13 = arith.constant dense<0.000000e+00> : vector<8x128xf32>
    %49 = tpu.matmul %47, %48, %cst_13 {dimension_numbers = #tpu.dot_dimension_numbers<[1], [0], [0], [1], [0, 0, 1, 1], [], []>} : vector<8x32xbf16>, vector<32x128xbf16>, vector<8x128xf32> -> vector<8x128xf32>
    %50 = vector.broadcast %6 : vector<1x128xf32> to vector<8x128xf32>
    %51 = arith.addf %49, %50 : vector<8x128xf32>
    %52 = tpu.iota {dimensions = array<i32: 0>} : vector<16x32xi32>
    %c7_i32 = arith.constant 7 : i32
    %53 = vector.broadcast %c7_i32 : i32 to vector<16x32xi32>
    %54 = arith.andi %52, %53 : vector<16x32xi32>
    %c1_i32 = arith.constant 1 : i32
    %55 = tpu.dynamic_rotate %30 by %c1_i32 dim 0 : vector<16x32xf32>, i32 -> vector<16x32xf32>
    %c15_i32 = arith.constant 15 : i32
    %56 = tpu.dynamic_rotate %30 by %c15_i32 dim 0 : vector<16x32xf32>, i32 -> vector<16x32xf32>
    %c0_i32 = arith.constant 0 : i32
    %57 = vector.broadcast %c0_i32 : i32 to vector<16x32xi32>
    %58 = arith.cmpi eq, %54, %57 : vector<16x32xi32>
    %cst_14 = arith.constant 0xFF800000 : f32
    %59 = vector.broadcast %cst_14 : f32 to vector<16x32xf32>
    %60 = arith.select %58, %59, %55 : vector<16x32xi1>, vector<16x32xf32>
    %c7_i32_15 = arith.constant 7 : i32
    %61 = vector.broadcast %c7_i32_15 : i32 to vector<16x32xi32>
    %62 = arith.cmpi eq, %54, %61 : vector<16x32xi32>
    %cst_16 = arith.constant 0xFF800000 : f32
    %63 = vector.broadcast %cst_16 : f32 to vector<16x32xf32>
    %64 = arith.select %62, %63, %56 : vector<16x32xi1>, vector<16x32xf32>
    %c0_i32_17 = arith.constant 0 : i32
    %65 = vector.broadcast %c0_i32_17 : i32 to vector<16x32xi32>
    %66 = arith.cmpi eq, %54, %65 : vector<16x32xi32>
    %cst_18 = arith.constant 0.000000e+00 : f32
    %67 = vector.broadcast %cst_18 : f32 to vector<16x32xf32>
    %68 = arith.select %66, %67, %55 : vector<16x32xi1>, vector<16x32xf32>
    %c7_i32_19 = arith.constant 7 : i32
    %69 = vector.broadcast %c7_i32_19 : i32 to vector<16x32xi32>
    %70 = arith.cmpi eq, %54, %69 : vector<16x32xi32>
    %cst_20 = arith.constant 0.000000e+00 : f32
    %71 = vector.broadcast %cst_20 : f32 to vector<16x32xf32>
    %72 = arith.select %70, %71, %56 : vector<16x32xi1>, vector<16x32xf32>
    %73 = arith.maximumf %60, %30 : vector<16x32xf32>
    %74 = arith.maximumf %73, %64 : vector<16x32xf32>
    %75 = arith.addf %68, %30 : vector<16x32xf32>
    %76 = arith.addf %75, %72 : vector<16x32xf32>
    %cst_21 = arith.constant 0.333333343 : f32
    %77 = vector.broadcast %cst_21 : f32 to vector<16x32xf32>
    %78 = arith.mulf %76, %77 : vector<16x32xf32>
    %79 = arith.addf %74, %78 : vector<16x32xf32>
    %80 = arith.truncf %79 : vector<16x32xf32> to vector<16x32xbf16>
    %c32 = arith.constant 32 : index
    %c0_22 = arith.constant 0 : index
    %81 = vector.load %arg1[%c32, %c0_22] : memref<128x128xbf16, #tpu.memory_space<vmem>>, vector<32x32xbf16>
    %cst_23 = arith.constant dense<0.000000e+00> : vector<16x32xf32>
    %82 = tpu.matmul %80, %81, %cst_23 {dimension_numbers = #tpu.dot_dimension_numbers<[1], [0], [0], [1], [0, 0, 1, 1], [], []>} : vector<16x32xbf16>, vector<32x32xbf16>, vector<16x32xf32> -> vector<16x32xf32>
    %83 = vector.broadcast %4 : vector<1x32xf32> to vector<16x32xf32>
    %84 = arith.addf %82, %83 : vector<16x32xf32>
    %cst_24 = arith.constant 0.000000e+00 : f32
    %85 = vector.broadcast %cst_24 : f32 to vector<16x32xf32>
    %86 = arith.maximumf %84, %85 : vector<16x32xf32>
    %87 = arith.truncf %86 : vector<16x32xf32> to vector<16x32xbf16>
    %c64 = arith.constant 64 : index
    %c0_25 = arith.constant 0 : index
    %88 = vector.load %arg1[%c64, %c0_25] : memref<128x128xbf16, #tpu.memory_space<vmem>>, vector<32x128xbf16>
    %cst_26 = arith.constant dense<0.000000e+00> : vector<16x128xf32>
    %89 = tpu.matmul %87, %88, %cst_26 {dimension_numbers = #tpu.dot_dimension_numbers<[1], [0], [0], [1], [0, 0, 1, 1], [], []>} : vector<16x32xbf16>, vector<32x128xbf16>, vector<16x128xf32> -> vector<16x128xf32>
    %90 = vector.broadcast %5 : vector<1x128xf32> to vector<16x128xf32>
    %91 = arith.addf %89, %90 : vector<16x128xf32>
    %cst_27 = arith.constant 5.000000e-01 : f32
    %92 = vector.broadcast %cst_27 : f32 to vector<16x128xf32>
    %93 = arith.mulf %92, %91 : vector<16x128xf32>
    %94 = math.tanh %93 : vector<16x128xf32>
    %cst_28 = arith.constant 1.000000e+00 : f32
    %95 = vector.broadcast %cst_28 : f32 to vector<16x128xf32>
    %96 = arith.addf %94, %95 : vector<16x128xf32>
    %cst_29 = arith.constant 5.000000e-01 : f32
    %97 = vector.broadcast %cst_29 : f32 to vector<16x128xf32>
    %98 = arith.mulf %97, %96 : vector<16x128xf32>
    %c118_i32 = arith.constant 118 : i32
    %99 = tpu.dynamic_rotate %91 by %c118_i32 dim 1 : vector<16x128xf32>, i32 -> vector<16x128xf32>
    %100 = math.tanh %99 : vector<16x128xf32>
    %101 = vector.extract_strided_slice %100 {offsets = [0, 0], sizes = [8, 128], strides = [1, 1]} : vector<16x128xf32> to vector<8x128xf32>
    %102 = vector.extract_strided_slice %98 {offsets = [0, 0], sizes = [8, 128], strides = [1, 1]} : vector<16x128xf32> to vector<8x128xf32>
    %cst_30 = arith.constant dense<0xFF800000> : vector<128xf32>
    %103 = vector.multi_reduction <maximumf>, %101, %cst_30 [0] : vector<8x128xf32> to vector<128xf32>
    %104 = vector.shape_cast %103 : vector<128xf32> to vector<1x128xf32>
    %105 = vector.broadcast %104 : vector<1x128xf32> to vector<8x128xf32>
    %106 = arith.subf %101, %105 : vector<8x128xf32>
    %107 = math.exp %106 : vector<8x128xf32>
    %cst_31 = arith.constant dense<0.000000e+00> : vector<128xf32>
    %108 = vector.multi_reduction <add>, %107, %cst_31 [0] : vector<8x128xf32> to vector<128xf32>
    %109 = vector.shape_cast %108 : vector<128xf32> to vector<1x128xf32>
    %110 = tpu.reciprocal %109 {approx = true} : vector<1x128xf32> -> vector<1x128xf32>
    %111 = vector.broadcast %110 : vector<1x128xf32> to vector<8x128xf32>
    %112 = arith.mulf %107, %111 : vector<8x128xf32>
    %113 = arith.mulf %112, %102 : vector<8x128xf32>
    %cst_32 = arith.constant dense<0.000000e+00> : vector<128xf32>
    %114 = vector.multi_reduction <add>, %113, %cst_32 [0] : vector<8x128xf32> to vector<128xf32>
    %115 = vector.shape_cast %114 : vector<128xf32> to vector<1x128xf32>
    %cst_33 = arith.constant dense<0xFF800000> : vector<128xf32>
    %116 = vector.multi_reduction <maximumf>, %102, %cst_33 [0] : vector<8x128xf32> to vector<128xf32>
    %117 = vector.shape_cast %116 : vector<128xf32> to vector<1x128xf32>
    %c0_34 = arith.constant 0 : index
    %c0_35 = arith.constant 0 : index
    %c0_36 = arith.constant 0 : index
    %118 = vector.load %arg3[%c0_34, %c0_35, %c0_36] : memref<2x16x128xf32, #tpu.memory_space<vmem>>, vector<1x8x128xf32>
    %119 = vector.shape_cast %118 : vector<1x8x128xf32> to vector<8x128xf32>
    %120 = vector.shape_cast %102 : vector<8x128xf32> to vector<1x8x128xf32>
    tpu.vector_store %arg3[%c0_34, %c0_35, %c0_36], %120 {strides = array<i32>} : memref<2x16x128xf32, #tpu.memory_space<vmem>>, vector<1x8x128xf32>,
    %c0_37 = arith.constant 0 : index
    %c8 = arith.constant 8 : index
    %c0_38 = arith.constant 0 : index
    %121 = vector.load %arg3[%c0_37, %c8, %c0_38] : memref<2x16x128xf32, #tpu.memory_space<vmem>>, vector<1x1x128xf32>
    %122 = vector.shape_cast %121 : vector<1x1x128xf32> to vector<1x128xf32>
    %123 = vector.shape_cast %115 : vector<1x128xf32> to vector<1x1x128xf32>
    tpu.vector_store %arg3[%c0_37, %c8, %c0_38], %123 {strides = array<i32>} : memref<2x16x128xf32, #tpu.memory_space<vmem>>, vector<1x1x128xf32>,
    %c0_39 = arith.constant 0 : index
    %c9 = arith.constant 9 : index
    %c0_40 = arith.constant 0 : index
    %124 = vector.load %arg3[%c0_39, %c9, %c0_40] : memref<2x16x128xf32, #tpu.memory_space<vmem>>, vector<1x1x128xf32>
    %125 = vector.shape_cast %124 : vector<1x1x128xf32> to vector<1x128xf32>
    %126 = vector.shape_cast %117 : vector<1x128xf32> to vector<1x1x128xf32>
    tpu.vector_store %arg3[%c0_39, %c9, %c0_40], %126 {strides = array<i32>} : memref<2x16x128xf32, #tpu.memory_space<vmem>>, vector<1x1x128xf32>,
    %127 = vector.extract_strided_slice %51 {offsets = [0, 0], sizes = [1, 128], strides = [1, 1]} : vector<8x128xf32> to vector<1x128xf32>
    %c0_41 = arith.constant 0 : index
    %c10 = arith.constant 10 : index
    %c0_42 = arith.constant 0 : index
    %128 = vector.load %arg3[%c0_41, %c10, %c0_42] : memref<2x16x128xf32, #tpu.memory_space<vmem>>, vector<1x1x128xf32>
    %129 = vector.shape_cast %128 : vector<1x1x128xf32> to vector<1x128xf32>
    %130 = vector.shape_cast %127 : vector<1x128xf32> to vector<1x1x128xf32>
    tpu.vector_store %arg3[%c0_41, %c10, %c0_42], %130 {strides = array<i32>} : memref<2x16x128xf32, #tpu.memory_space<vmem>>, vector<1x1x128xf32>,
    %cst_43 = arith.constant 0.000000e+00 : f32
    %131 = vector.broadcast %cst_43 : f32 to vector<5x128xf32>
    %c0_44 = arith.constant 0 : index
    %c11 = arith.constant 11 : index
    %c0_45 = arith.constant 0 : index
    %132 = vector.load %arg3[%c0_44, %c11, %c0_45] : memref<2x16x128xf32, #tpu.memory_space<vmem>>, vector<1x5x128xf32>
    %133 = vector.shape_cast %132 : vector<1x5x128xf32> to vector<5x128xf32>
    %134 = vector.shape_cast %131 : vector<5x128xf32> to vector<1x5x128xf32>
    tpu.vector_store %arg3[%c0_44, %c11, %c0_45], %134 {strides = array<i32>} : memref<2x16x128xf32, #tpu.memory_space<vmem>>, vector<1x5x128xf32>,
    %135 = vector.extract_strided_slice %100 {offsets = [8, 0], sizes = [8, 128], strides = [1, 1]} : vector<16x128xf32> to vector<8x128xf32>
    %136 = vector.extract_strided_slice %98 {offsets = [8, 0], sizes = [8, 128], strides = [1, 1]} : vector<16x128xf32> to vector<8x128xf32>
    %cst_46 = arith.constant dense<0xFF800000> : vector<128xf32>
    %137 = vector.multi_reduction <maximumf>, %135, %cst_46 [0] : vector<8x128xf32> to vector<128xf32>
    %138 = vector.shape_cast %137 : vector<128xf32> to vector<1x128xf32>
    %139 = vector.broadcast %138 : vector<1x128xf32> to vector<8x128xf32>
    %140 = arith.subf %135, %139 : vector<8x128xf32>
    %141 = math.exp %140 : vector<8x128xf32>
    %cst_47 = arith.constant dense<0.000000e+00> : vector<128xf32>
    %142 = vector.multi_reduction <add>, %141, %cst_47 [0] : vector<8x128xf32> to vector<128xf32>
    %143 = vector.shape_cast %142 : vector<128xf32> to vector<1x128xf32>
    %144 = tpu.reciprocal %143 {approx = true} : vector<1x128xf32> -> vector<1x128xf32>
    %145 = vector.broadcast %144 : vector<1x128xf32> to vector<8x128xf32>
    %146 = arith.mulf %141, %145 : vector<8x128xf32>
    %147 = arith.mulf %146, %136 : vector<8x128xf32>
    %cst_48 = arith.constant dense<0.000000e+00> : vector<128xf32>
    %148 = vector.multi_reduction <add>, %147, %cst_48 [0] : vector<8x128xf32> to vector<128xf32>
    %149 = vector.shape_cast %148 : vector<128xf32> to vector<1x128xf32>
    %cst_49 = arith.constant dense<0xFF800000> : vector<128xf32>
    %150 = vector.multi_reduction <maximumf>, %136, %cst_49 [0] : vector<8x128xf32> to vector<128xf32>
    %151 = vector.shape_cast %150 : vector<128xf32> to vector<1x128xf32>
    %c1 = arith.constant 1 : index
    %c0_50 = arith.constant 0 : index
    %c0_51 = arith.constant 0 : index
    %152 = vector.load %arg3[%c1, %c0_50, %c0_51] : memref<2x16x128xf32, #tpu.memory_space<vmem>>, vector<1x8x128xf32>
    %153 = vector.shape_cast %152 : vector<1x8x128xf32> to vector<8x128xf32>
    %154 = vector.shape_cast %136 : vector<8x128xf32> to vector<1x8x128xf32>
    tpu.vector_store %arg3[%c1, %c0_50, %c0_51], %154 {strides = array<i32>} : memref<2x16x128xf32, #tpu.memory_space<vmem>>, vector<1x8x128xf32>,
    %c1_52 = arith.constant 1 : index
    %c8_53 = arith.constant 8 : index
    %c0_54 = arith.constant 0 : index
    %155 = vector.load %arg3[%c1_52, %c8_53, %c0_54] : memref<2x16x128xf32, #tpu.memory_space<vmem>>, vector<1x1x128xf32>
    %156 = vector.shape_cast %155 : vector<1x1x128xf32> to vector<1x128xf32>
    %157 = vector.shape_cast %149 : vector<1x128xf32> to vector<1x1x128xf32>
    tpu.vector_store %arg3[%c1_52, %c8_53, %c0_54], %157 {strides = array<i32>} : memref<2x16x128xf32, #tpu.memory_space<vmem>>, vector<1x1x128xf32>,
    %c1_55 = arith.constant 1 : index
    %c9_56 = arith.constant 9 : index
    %c0_57 = arith.constant 0 : index
    %158 = vector.load %arg3[%c1_55, %c9_56, %c0_57] : memref<2x16x128xf32, #tpu.memory_space<vmem>>, vector<1x1x128xf32>
    %159 = vector.shape_cast %158 : vector<1x1x128xf32> to vector<1x128xf32>
    %160 = vector.shape_cast %151 : vector<1x128xf32> to vector<1x1x128xf32>
    tpu.vector_store %arg3[%c1_55, %c9_56, %c0_57], %160 {strides = array<i32>} : memref<2x16x128xf32, #tpu.memory_space<vmem>>, vector<1x1x128xf32>,
    %161 = vector.extract_strided_slice %51 {offsets = [1, 0], sizes = [1, 128], strides = [1, 1]} : vector<8x128xf32> to vector<1x128xf32>
    %c1_58 = arith.constant 1 : index
    %c10_59 = arith.constant 10 : index
    %c0_60 = arith.constant 0 : index
    %162 = vector.load %arg3[%c1_58, %c10_59, %c0_60] : memref<2x16x128xf32, #tpu.memory_space<vmem>>, vector<1x1x128xf32>
    %163 = vector.shape_cast %162 : vector<1x1x128xf32> to vector<1x128xf32>
    %164 = vector.shape_cast %161 : vector<1x128xf32> to vector<1x1x128xf32>
    tpu.vector_store %arg3[%c1_58, %c10_59, %c0_60], %164 {strides = array<i32>} : memref<2x16x128xf32, #tpu.memory_space<vmem>>, vector<1x1x128xf32>,
    %cst_61 = arith.constant 0.000000e+00 : f32
    %165 = vector.broadcast %cst_61 : f32 to vector<5x128xf32>
    %c1_62 = arith.constant 1 : index
    %c11_63 = arith.constant 11 : index
    %c0_64 = arith.constant 0 : index
    %166 = vector.load %arg3[%c1_62, %c11_63, %c0_64] : memref<2x16x128xf32, #tpu.memory_space<vmem>>, vector<1x5x128xf32>
    %167 = vector.shape_cast %166 : vector<1x5x128xf32> to vector<5x128xf32>
    %168 = vector.shape_cast %165 : vector<5x128xf32> to vector<1x5x128xf32>
    tpu.vector_store %arg3[%c1_62, %c11_63, %c0_64], %168 {strides = array<i32>} : memref<2x16x128xf32, #tpu.memory_space<vmem>>, vector<1x5x128xf32>,
    return
  }
}

</mosaic_0001>

<bundles_post_ra>
// kernel: birdclef_forward.1
= control target key start
LH: loop header
LB: loop body
LE: loop exit
PB: predicated region body
PF: predicated region fallthrough
CT: control target
= control target key end

     0   :  { %vm92_vm0 = vcmask 261120   ;;  %v731_v11 = vmov 0.0   ;;  %vm732_vm1 = vmmov 0   ;;  %v36_v13 = vlaneseq  ;;  %s914_s1 = inlined_call_operand.vmem [shape: bf16[128,128], index: 1, kind: input, shape index: {}]   ;;  %s915_s0 = inlined_call_operand.vmem [shape: bf16[128,32], index: 0, kind: input, shape index: {}]   ;;  %s916_s3 = inlined_call_operand.vmem [shape: f32[2,16,128], index: 3, kind: output, shape index: {}]   ;;  %s917_s2 = inlined_call_operand.vmem [shape: f32[8,128], index: 2, kind: input, shape index: {}]  }
   0x1   :  { %v699_v0 = vld [vmem:[%s914_s1 + $0x8] sm:$0xff]   ;;  %v700_v1 = vld [vmem:[%s914_s1] sm:$0xff]   ;;  %v703_v4 = vld [vmem:[%s915_s0 + $0x10] sm:$0xff]   ;;  %672 = vmatprep.subr.bf16.mxu1 %v731_v11  ;;  %676 = vmatprep.mubr.msk.bf16.mxu1 %vm732_vm1, %v731_v11  ;;  %560 = vst [vmem:[%s916_s3 + $0xb] sm:$0x1f] %v731_v11  ;;  %vm263_vm7 = vcmask 1040384  }
   0x2   :  { %652 = vmatprep.subr.bf16.mxu0 %v699_v0  ;;  %v701_v2 = vld [vmem:[%s915_s0] sm:$0xff]   ;;  %v702_v3 = vld [vmem:[%s915_s0 + $0x8] sm:$0xff]   ;;  %v704_v5 = vld [vmem:[%s915_s0 + $0x18] sm:$0xff]   ;;  %632 = vst [vmem:[%s916_s3 + $0x1b] sm:$0x1f] %v731_v11  ;;  %v811_v14 = vshrl.u32 %v36_v13, 7 }
   0x3   :  { %653 = vmatpush3.bf16.msra.mxu0 %v699_v0  ;;  %656 = vmatprep.mubr.msk.bf16.mxu0 %vm92_vm0, %v701_v2  ;;  %v705_v6 = vld [vmem:[%s915_s0 + $0x20] sm:$0xff]   ;;  %v706_v7 = vld [vmem:[%s915_s0 + $0x28] sm:$0xff]   ;;  %v707_v8 = vld [vmem:[%s915_s0 + $0x30] sm:$0xff]   ;;  %vm265_vm9 = vcmask 1041408  }
   0x4   :  { %654 = vmatprep.subr.bf16.mxu0 %v700_v1  ;;  %v708_v9 = vld [vmem:[%s915_s0 + $0x38] sm:$0xff]   ;;  %v710_v12 = vld [vmem:[%s914_s1 + $0x30] sm:$0xff]   ;;  %v38_v17 = vsub.s32 0, %v811_v14  ;;  %v817_v18 = vld [vmem:[%s917_s2] sm:$0xff]  ;;  %vm348_vm2 = vcmp.lt.s32.totalorder %v811_v14, 1  ;;  %vm353_vm5 = vcmp.lt.s32.totalorder %v811_v14, 7 }
   0x5   :  { %v709_v10 = vld [vmem:[%s914_s1 + $0x38] sm:$0xff]  }
   0x6   :  { %673 = vmatpush3.bf16.msra.mxu1 %v709_v10  ;;  %v39_v21 = vrot.slane %v817_v18, %v38_v17 }
   0x7   :  { %655 = vmatpush3.bf16.msra.mxu0 %v700_v1  ;;  %674 = vmatprep.subr.bf16.mxu1 %v731_v11 }
   0xa   :  { %657 = vmatmul.mubr.msk.bf16.vlgmr.msra.gmra.mxu0 %vm92_vm0, %v702_v3  ;;  %675 = vmatpush3.bf16.msra.mxu1 %v710_v12 }
   0xb   :  { %660 = vmatprep.mubr.msk.bf16.mxu0 %vm92_vm0, %v703_v4  ;;  %680 = vmatprep.subr.bf16.mxu1 %v731_v11 }
  0x12   :  { %661 = vmatmul.mubr.msk.bf16.gmra.mxu0 %vm92_vm0, %v704_v5 }
  0x13   :  { %664 = vmatprep.mubr.msk.bf16.mxu0 %vm92_vm0, %v705_v6 }
  0x1a   :  { %665 = vmatmul.mubr.msk.bf16.gmra.mxu0 %vm92_vm0, %v706_v7 }
  0x1b   :  { %668 = vmatprep.mubr.msk.bf16.mxu0 %vm92_vm0, %v707_v8 }
  0x22   :  { %669 = vmatmul.mubr.msk.bf16.gmra.mxu0 %vm92_vm0, %v708_v9 }
  0xca   :  { %v658_v15 = vpop.f32.mrf.mxu0 }
  0xcb   :  { %v160_v25 = vadd.f32 %v658_v15, %v39_v21 }
  0xcc   :  { %v151_v16 = vpop.f32.mrf.mxu0 }
  0xcd   :  { %v152_v23 = vadd.f32 %v151_v16, %v39_v21  ;;  %v216_v31 = vmax.f32 %v160_v25, 0.0 }
  0xce   :  { %v659_v19 = vpop.f32.mrf.mxu0 }
  0xcf   :  { %v214_v28 = vmax.f32 %v152_v23, 0.0  ;;  %v163_v32 = vadd.f32 %v659_v19, %v39_v21 }
  0xd0   :  { %v154_v20 = vpop.f32.mrf.mxu0 }
  0xd1   :  { %v155_v29 = vadd.f32 %v154_v20, %v39_v21  ;;  %v230_v36 = vadd.f32 %v216_v31, %v214_v28  ;;  %v217_v40 = vmax.f32 %v163_v32, 0.0  ;;  %v344_v32 = vand.u32 7, %v811_v14 }
  0xd2   :  { %v662_v22 = vpop.f32.mrf.mxu0 }
  0xd3   :  { %v215_v37 = vmax.f32 %v155_v29, 0.0  ;;  %v176_v38 = vadd.f32 %v662_v22, %v39_v21  ;;  %vm829_vm4 = vcmp.eq.s32.totalorder %v344_v32, 0  ;;  %vm837_vm6 = vcmp.eq.s32.totalorder %v344_v32, 7 }
  0xd4   :  { %v167_v24 = vpop.f32.mrf.mxu0 }
  0xd5   :  { %v168_v26 = vadd.f32 %v167_v24, %v39_v21  ;;  %v231_v45 = vadd.f32 %v217_v40, %v215_v37  ;;  %v220_v46 = vmax.f32 %v176_v38, 0.0  ;;  %v343_v24 = vadd.s32 8, %v811_v14 }
  0xd6   :  { %v663_v27 = vpop.f32.mrf.mxu0 }
  0xd7   :  { %v218_v33 = vmax.f32 %v168_v26, 0.0  ;;  %v179_v47 = vadd.f32 %v663_v27, %v39_v21  ;;  %v345_v29 = vand.u32 7, %v343_v24  ;;  %v713_v24 = vld [vmem:[%s914_s1 + $0x28] sm:$0xff]  }
  0xd8   :  { %v170_v30 = vpop.f32.mrf.mxu0 }
  0xd9   :  { %v171_v34 = vadd.f32 %v170_v30, %v39_v21  ;;  %v232_v41 = vadd.f32 %v230_v36, %v218_v33  ;;  %v221_v55 = vmax.f32 %v179_v47, 0.0  ;;  %vm825_vm3 = vcmp.eq.s32.totalorder %v345_v29, 0 }
  0xda   :  { %v666_v35 = vpop.f32.mrf.mxu0  ;;  %vm844_vm8 = vcmp.eq.s32.totalorder %v345_v29, 7 }
  0xdb   :  { %v219_v42 = vmax.f32 %v171_v34, 0.0  ;;  %v192_v51 = vadd.f32 %v666_v35, %v39_v21  ;;  %v234_v52 = vadd.f32 %v232_v41, %v220_v46 }
  0xdc   :  { %v183_v39 = vpop.f32.mrf.mxu0 }
  0xdd   :  { %v184_v43 = vadd.f32 %v183_v39, %v39_v21  ;;  %v233_v50 = vadd.f32 %v231_v45, %v219_v42  ;;  %v224_v60 = vmax.f32 %v192_v51, 0.0  ;;  %v269_v42 = vsub.s32 1, %v811_v14 }
  0xde   :  { %v667_v44 = vpop.f32.mrf.mxu0 }
  0xdf   :  { %v222_v48 = vmax.f32 %v184_v43, 0.0  ;;  %v195_v58 = vadd.f32 %v667_v44, %v39_v21  ;;  %v235_v61 = vadd.f32 %v233_v50, %v221_v55  ;;  %v274_v50 = vsub.s32 2, %v811_v14 }
  0xe0   :  { %v186_v49 = vpop.f32.mrf.mxu0 }
  0xe1   :  { %v187_v53 = vadd.f32 %v186_v49, %v39_v21  ;;  %v236_v56 = vadd.f32 %v234_v52, %v222_v48  ;;  %v225_v4 = vmax.f32 %v195_v58, 0.0  ;;  %v270_v52 = vrot.slane %v817_v18, %v269_v42 }
  0xe2   :  { %v670_v54 = vpop.f32.mrf.mxu0  ;;  %v454_v42 = vsub.s32 4, %v811_v14 }
  0xe3   :  { %v223_v57 = vmax.f32 %v187_v53, 0.0  ;;  %v208_v62 = vadd.f32 %v670_v54, %v39_v21  ;;  %v238_v3 = vadd.f32 %v236_v56, %v224_v60  ;;  %v275_v60 = vrot.slane %v817_v18, %v274_v50 }
  0xe4   :  { %v199_v59 = vpop.f32.mrf.mxu0 }
  0xe5   :  { %v200_v63 = vadd.f32 %v199_v59, %v39_v21  ;;  %v237_v1 = vadd.f32 %v235_v61, %v223_v57  ;;  %v228_v6 = vmax.f32 %v208_v62, 0.0 }
  0xe6   :  { %v671_v0 = vpop.f32.mrf.mxu0 }
  0xe7   :  { %v226_v2 = vmax.f32 %v200_v63, 0.0  ;;  %v211_v8 = vadd.f32 %v671_v0, %v39_v21  ;;  %v239_v13 = vadd.f32 %v237_v1, %v225_v4 }
  0xe8   :  { %v202_v5 = vpop.f32.mrf.mxu0 }
  0xe9   :  { %v240_v7 = vadd.f32 %v238_v3, %v226_v2  ;;  %v203_v9 = vadd.f32 %v202_v5, %v39_v21  ;;  %v229_v16 = vmax.f32 %v211_v8, 0.0  ;;  %v711_v8 = vld [vmem:[%s914_s1 + $0x18] sm:$0xff]  }
  0xeb   :  { %v242_v10 = vadd.f32 %v240_v7, %v228_v6  ;;  %v227_v12 = vmax.f32 %v203_v9, 0.0 }
  0xed   :  { %v244_v15 = vmul.f32 0.125, %v242_v10  ;;  %v241_v17 = vadd.f32 %v239_v13, %v227_v12 }
  0xef   :  { %v246_v19 = vsel %vm92_vm0, %v244_v15, 0.0  ;;  %v243_v20 = vadd.f32 %v241_v17, %v229_v16  ;;  %v346_v33 = vrot.slane %v244_v15, 7  ;;  %v351_v45 = vrot.slane %v244_v15, 1 }
  0xf0   :  { %v247_v22 = vrot.slane %v246_v19, 4 }
  0xf1   :  { %v245_v23 = vmul.f32 0.125, %v243_v20 }
  0xf2   :  { %v248_v25 = vadd.f32 %v247_v22, %v246_v19 }
  0xf3   :  { %v255_v26 = vsel %vm92_vm0, %v245_v23, 0.0  ;;  %v347_v30 = vrot.slane %v245_v23, 7  ;;  %v352_v41 = vrot.slane %v245_v23, 1 }
  0xf4   :  { %v256_v27 = vrot.slane %v255_v26, 4  ;;  %v249_v28 = vrot.slane %v248_v25, 2 }
  0xf5   :  { %v349_v37 = vsel %vm348_vm2, %v346_v33, %v347_v30  ;;  %v350_v39 = vsel %vm348_vm2, %v347_v30, %v346_v33  ;;  %v354_v53 = vsel %vm353_vm5, %v351_v45, %v352_v41  ;;  %v355_v54 = vsel %vm353_vm5, %v352_v41, %v351_v45 }
  0xf6   :  { %v257_v21 = vadd.f32 %v256_v27, %v255_v26  ;;  %v250_v31 = vadd.f32 %v249_v28, %v248_v25  ;;  %v365_v46 = vsel %vm825_vm3, 0.0, %v349_v37  ;;  %v364_v48 = vsel %vm829_vm4, 0.0, %v350_v39  ;;  %v714_v25 = vld [vmem:[%s914_s1 + $0x20] sm:$0xff]  }
  0xf7   :  { %v373_v55 = vadd.f32 %v365_v46, %v245_v23  ;;  %v372_v58 = vadd.f32 %v364_v48, %v244_v15  ;;  %v358_v61 = vsel %vm829_vm4, -inf, %v350_v39  ;;  %v359_v63 = vsel %vm825_vm3, -inf, %v349_v37 }
  0xf8   :  { %v251_v34 = vrot.slane %v250_v31, 1  ;;  %v258_v35 = vrot.slane %v257_v21, 2  ;;  %v366_v0 = vsel %vm837_vm6, 0.0, %v354_v53  ;;  %v367_v1 = vsel %vm844_vm8, 0.0, %v355_v54 }
  0xf9   :  { %v374_v3 = vadd.f32 %v372_v58, %v366_v0  ;;  %v375_v4 = vadd.f32 %v373_v55, %v367_v1  ;;  %v368_v6 = vmax.f32 %v358_v61, %v244_v15  ;;  %v369_v7 = vmax.f32 %v359_v63, %v245_v23  ;;  %v712_v15 = vld [vmem:[%s914_s1 + $0x10] sm:$0xff]   ;;  %s733_s1 = smov 118  }
  0xfa   :  { %v259_v38 = vadd.f32 %v258_v35, %v257_v21  ;;  %v252_v43 = vadd.f32 %v251_v34, %v250_v31  ;;  %v362_v13 = vsel %vm837_vm6, -inf, %v354_v53  ;;  %v363_v16 = vsel %vm844_vm8, -inf, %v355_v54 }
  0xfb   :  { %v376_v10 = vmul.f32 0.33333334, %v374_v3  ;;  %v377_v12 = vmul.f32 0.33333334, %v375_v4  ;;  %v370_v17 = vmax.f32 %v368_v6, %v362_v13  ;;  %v371_v19 = vmax.f32 %v369_v7, %v363_v16 }
  0xfc   :  { %v260_v44 = vrot.slane %v259_v38, 1  ;;  %v254_v56 = vmul.f32 0.125, %v252_v43  ;;  %v284_v26 = vsub.s32 5, %v811_v14  ;;  %v455_v43 = vrot.slane %v817_v18, %v454_v42 }
  0xfd   :  { %v378_v20 = vadd.f32 %v376_v10, %v370_v17  ;;  %v379_v22 = vadd.f32 %v377_v12, %v371_v19 }
  0xfe   :  { %v261_v49 = vadd.f32 %v260_v44, %v259_v38  ;;  %v285_v27 = vrot.slane %v817_v18, %v284_v26 }
  0xff   :  { %v380_v23 = vpack.c.bf16 %v379_v22, %v378_v20 }
 0x100   :  { %v262_v57 = vmul.f32 0.125, %v261_v49 }
 0x102   :  { %v264_v59 = vsel %vm263_vm7, %v254_v56, %v262_v57 }
 0x103   :  { %v266_v62 = vsel %vm265_vm9, %v264_v59, 0.0 }
 0x104   :  { %v271_v2 = vmul.f32 %v270_v52, %v266_v62 }
 0x106   :  { %v276_v5 = vadd.f32 %v275_v60, %v271_v2 }
 0x108   :  { %v277_v9 = vpack.c.bf16 %v276_v5, %v276_v5 }
 0x10a   :  { %677 = vmatmul.mubr.msk.bf16.vlgmr.msra.gmra.mxu1 %vm92_vm0, %v277_v9 }
 0x10b   :  { %681 = vmatpush3.bf16.msra.mxu1 %v711_v8  ;;  %684 = vmatprep.mubr.msk.bf16.mxu1 %vm732_vm1, %v731_v11 }
 0x10c   :  { %682 = vmatprep.subr.bf16.mxu1 %v731_v11 }
 0x10f   :  { %683 = vmatpush3.bf16.msra.mxu1 %v712_v15 }
 0x110   :  { %688 = vmatprep.subr.bf16.mxu1 %v731_v11 }
 0x112   :  { %685 = vmatmul.mubr.msk.bf16.vlgmr.msra.gmra.mxu1 %vm92_vm0, %v380_v23 }
 0x113   :  { %692 = vmatprep.mubr.msk.bf16.mxu1 %vm732_vm1, %v731_v11  ;;  %689 = vmatpush3.bf16.msra.mxu1 %v713_v24 }
 0x114   :  { %690 = vmatprep.subr.bf16.mxu1 %v731_v11  ;;  %v387_v11 = vsub.s32 3, %v811_v14 }
 0x116   :  { %v388_v32 = vrot.slane %v817_v18, %v387_v11 }
 0x117   :  { %691 = vmatpush3.bf16.msra.mxu1 %v714_v25 }
 0x1ca   :  { %v335_v28 = vpop.f32.mrf.mxu1 }
 0x1cb   :  { %v336_v29 = vadd.f32 %v335_v28, %v285_v27 }
 0x1cc   :  { %v678_v21 = vpop.f32.mrf.mxu1 }
 0x1cd   :  { %559 = vst [vmem:[%s916_s3 + $0xa] sm:$0x1] %v336_v29  ;;  %631 = vst [vmem:[%s916_s3 + $0x19] sm:$0x2] %v336_v29 }
 0x1ce   :  { %v338_v30 = vpop.f32.mrf.mxu1 }
 0x1d0   :  { %v679_v31 = vpop.f32.mrf.mxu1 }
 0x1d2   :  { %v438_v33 = vpop.f32.mrf.mxu1 }
 0x1d3   :  { %v439_v35 = vadd.f32 %v438_v33, %v388_v32 }
 0x1d4   :  { %v686_v34 = vpop.f32.mrf.mxu1 }
 0x1d5   :  { %v445_v39 = vmax.f32 %v439_v35, 0.0 }
 0x1d6   :  { %v441_v36 = vpop.f32.mrf.mxu1 }
 0x1d7   :  { %v442_v37 = vadd.f32 %v441_v36, %v388_v32 }
 0x1d8   :  { %v687_v38 = vpop.f32.mrf.mxu1 }
 0x1d9   :  { %v446_v40 = vmax.f32 %v442_v37, 0.0 }
 0x1db   :  { %v447_v41 = vpack.c.bf16 %v446_v40, %v445_v39 }
 0x1dd   :  { %693 = vmatmul.mubr.msk.bf16.vlgmr.msra.gmra.mxu1 %vm92_vm0, %v447_v41 }
 0x29d   :  { %v505_v44 = vpop.f32.mrf.mxu1 }
 0x29e   :  { %v506_v45 = vadd.f32 %v505_v44, %v455_v43 }
 0x29f   :  { %v694_v46 = vpop.f32.mrf.mxu1 }
 0x2a0   :  { %v512_v47 = vmul.f32 0.5, %v506_v45  ;;  %520 = vrot.lane.b32.xlu0 %v506_v45, %s733_s1 }
 0x2a1   :  { %v508_v48 = vpop.f32.mrf.mxu1 }
 0x2a2   :  { %715 = vtanh.f32 %v512_v47  ;;  %v509_v49 = vadd.f32 %v508_v48, %v455_v43 }
 0x2a3   :  { %v695_v50 = vpop.f32.mrf.mxu1 }
 0x2a4   :  { %v513_v51 = vmul.f32 0.5, %v509_v49  ;;  %522 = vrot.lane.b32.xlu0 %v509_v49, %s733_s1 }
 0x2a6   :  { %717 = vtanh.f32 %v513_v51 }
 0x2af   :  { %v716_v52 = vpop.eup %715 }
 0x2b0   :  { %v516_v53 = vadd.f32 1.0, %v716_v52 }
 0x2b2   :  { %v518_v54 = vmul.f32 0.5, %v516_v53 }
 0x2b3   :  { %v718_v55 = vpop.eup %717 }
 0x2b4   :  { %v550_v14 = vrot.slane %v518_v54, 4  ;;  %556 = vst [vmem:[%s916_s3] sm:$0xff] %v518_v54  ;;  %v517_v18 = vadd.f32 1.0, %v718_v55 }
 0x2b6   :  { %v551_v56 = vmax.f32 %v518_v54, %v550_v14  ;;  %v519_v57 = vmul.f32 0.5, %v517_v18 }
 0x2b8   :  { %v552_v58 = vrot.slane %v551_v56, 2  ;;  %v585_v59 = vrot.slane %v519_v57, 4  ;;  %628 = vst [vmem:[%s916_s3 + $0x10] sm:$0xff] %v519_v57 }
 0x2ba   :  { %v553_v60 = vmax.f32 %v551_v56, %v552_v58  ;;  %v586_v61 = vmax.f32 %v519_v57, %v585_v59 }
 0x2bc   :  { %v554_v62 = vrot.slane %v553_v60, 1  ;;  %v587_v63 = vrot.slane %v586_v61, 2 }
 0x2be   :  { %v555_v0 = vmax.f32 %v553_v60, %v554_v62  ;;  %v588_v1 = vmax.f32 %v586_v61, %v587_v63 }
 0x2c0   :  { %558 = vst [vmem:[%s916_s3 + $0x9] sm:$0x1] %v555_v0  ;;  %v589_v2 = vrot.slane %v588_v1, 1 }
 0x2c2   :  { %v590_v3 = vmax.f32 %v588_v1, %v589_v2 }
 0x2c4   :  { %630 = vst [vmem:[%s916_s3 + $0x19] sm:$0x1] %v590_v3 }
 0x312   :  { %v521_v4 = vpop.permute.xlu0 %520 }
 0x313   :  { %719 = vtanh.f32 %v521_v4 }
 0x316   :  { %v523_v5 = vpop.permute.xlu0 %522 }
 0x317   :  { %721 = vtanh.f32 %v523_v5 }
 0x320   :  { %v720_v6 = vpop.eup %719 }
 0x321   :  { %v526_v7 = vrot.slane %v720_v6, 4 }
 0x323   :  { %v527_v8 = vmax.f32 %v720_v6, %v526_v7 }
 0x324   :  { %v722_v9 = vpop.eup %721 }
 0x325   :  { %v528_v10 = vrot.slane %v527_v8, 2  ;;  %v561_v12 = vrot.slane %v722_v9, 4 }
 0x327   :  { %v529_v13 = vmax.f32 %v527_v8, %v528_v10  ;;  %v562_v16 = vmax.f32 %v722_v9, %v561_v12 }
 0x329   :  { %v530_v17 = vrot.slane %v529_v13, 1  ;;  %v563_v19 = vrot.slane %v562_v16, 2 }
 0x32b   :  { %v531_v15 = vmax.f32 %v529_v13, %v530_v17  ;;  %v564_v20 = vmax.f32 %v562_v16, %v563_v19 }
 0x32d   :  { %v532_v22 = vsub.f32 %v720_v6, %v531_v15  ;;  %v565_v23 = vrot.slane %v564_v20, 1 }
 0x32f   :  { %v533_v24 = vmul.f32 1.442695, %v532_v22  ;;  %v566_v25 = vmax.f32 %v564_v20, %v565_v23 }
 0x331   :  { %723 = vpow2.f32 %v533_v24  ;;  %v567_v26 = vsub.f32 %v722_v9, %v566_v25 }
 0x333   :  { %v568_v27 = vmul.f32 1.442695, %v567_v26 }
 0x335   :  { %725 = vpow2.f32 %v568_v27 }
 0x33e   :  { %v724_v28 = vpop.eup %723 }
 0x33f   :  { %v535_v29 = vrot.slane %v724_v28, 4 }
 0x341   :  { %v536_v21 = vadd.f32 %v724_v28, %v535_v29 }
 0x342   :  { %v726_v11 = vpop.eup %725 }
 0x343   :  { %v537_v30 = vrot.slane %v536_v21, 2  ;;  %v570_v31 = vrot.slane %v726_v11, 4 }
 0x345   :  { %v538_v32 = vadd.f32 %v537_v30, %v536_v21  ;;  %v571_v33 = vadd.f32 %v726_v11, %v570_v31 }
 0x347   :  { %v539_v34 = vrot.slane %v538_v32, 1  ;;  %v572_v35 = vrot.slane %v571_v33, 2 }
 0x349   :  { %v540_v36 = vadd.f32 %v539_v34, %v538_v32  ;;  %v573_v37 = vadd.f32 %v572_v35, %v571_v33 }
 0x34b   :  { %727 = vrcp.f32 %v540_v36  ;;  %v574_v38 = vrot.slane %v573_v37, 1 }
 0x34d   :  { %v575_v39 = vadd.f32 %v574_v38, %v573_v37 }
 0x34f   :  { %729 = vrcp.f32 %v575_v39 }
 0x358   :  { %v728_v40 = vpop.eup %727 }
 0x359   :  { %v542_v41 = vmul.f32 %v728_v40, %v724_v28 }
 0x35b   :  { %v543_v42 = vmul.f32 %v542_v41, %v518_v54 }
 0x35c   :  { %v730_v43 = vpop.eup %729 }
 0x35d   :  { %v544_v44 = vrot.slane %v543_v42, 4  ;;  %v577_v45 = vmul.f32 %v730_v43, %v726_v11 }
 0x35f   :  { %v545_v46 = vadd.f32 %v544_v44, %v543_v42  ;;  %v578_v47 = vmul.f32 %v577_v45, %v519_v57 }
 0x361   :  { %v546_v48 = vrot.slane %v545_v46, 2  ;;  %v579_v49 = vrot.slane %v578_v47, 4 }
 0x363   :  { %v547_v50 = vadd.f32 %v546_v48, %v545_v46  ;;  %v580_v51 = vadd.f32 %v579_v49, %v578_v47 }
 0x365   :  { %v548_v52 = vrot.slane %v547_v50, 1  ;;  %v581_v53 = vrot.slane %v580_v51, 2 }
 0x367   :  { %v549_v55 = vadd.f32 %v548_v52, %v547_v50  ;;  %v582_v14 = vadd.f32 %v581_v53, %v580_v51 }
 0x369   :  { %557 = vst [vmem:[%s916_s3 + $0x8] sm:$0x1] %v549_v55  ;;  %v583_v18 = vrot.slane %v582_v14, 1 }
 0x36b   :  { %v584_v56 = vadd.f32 %v583_v18, %v582_v14 }
 0x36d   :  { %629 = vst [vmem:[%s916_s3 + $0x18] sm:$0x1] %v584_v56 }

</bundles_post_ra>
